<compile_context>
chip_gen: v7x
topology: tpu7x:2x2x1
jax: 0.10.0
libtpu: 0.0.40
codegen_flags: <defaults>
</compile_context>

<pallas_src>
import functools

import jax
import jax.numpy as jnp
from jax.experimental import pallas as pl
from jax.experimental.pallas import tpu as pltpu


def _leaky_relu(x, slope=0.2):
    return jnp.where(x > 0, x, slope * x)


def _round_up(x, m):
    return (x + m - 1) // m * m


# ---------------------------------------------------------------------------
# Kernel
# ---------------------------------------------------------------------------
def idm_kernel(x_ref, w_ref, b_ref, out_ref, *, s2, hidden, action_dim):
    """One batch tile of the fused 3-layer MLP.

    x_ref:   [TM, 2*state_dim]                  (bf16)   row tile of cat(state, next_state)
    w_ref:   [2S + 2H, max(H, A)]               (bf16)   packed W1 / W2 / W3
    b_ref:   [3, max(H, A)]                     (f32)    packed b1 / b2 / b3
    out_ref: [TM, action_dim]                   (f32)
    """
    x = x_ref[...]

    w1 = w_ref[0:s2, 0:hidden]
    w2 = w_ref[s2:s2 + hidden, 0:hidden]
    w3 = w_ref[s2 + hidden:s2 + 2 * hidden, 0:action_dim]
    b1 = b_ref[0:1, 0:hidden]
    b2 = b_ref[1:2, 0:hidden]
    b3 = b_ref[2:3, 0:action_dim]

    # Layer 1: cat(state, next_state) @ W1 + b1  (x already concatenated in wrapper)
    h = jnp.dot(x, w1, preferred_element_type=jnp.float32) + b1
    h = _leaky_relu(h)

    # Layer 2
    h = jnp.dot(h.astype(w2.dtype), w2, preferred_element_type=jnp.float32) + b2
    h = _leaky_relu(h)

    # Layer 3 (output, no activation)
    out = jnp.dot(h.astype(w3.dtype), w3, preferred_element_type=jnp.float32) + b3
    out_ref[...] = out.astype(out_ref.dtype)


# ---------------------------------------------------------------------------
# Parameter packing (done once, outside the per-call path)
# ---------------------------------------------------------------------------
def pack_params(w1, b1, w2, b2, w3, b3, compute_dtype=jnp.bfloat16):
    """Pack the 6 tiny Linear params into one weight slab + one bias slab.

    w1: [2*state_dim, hidden], w2: [hidden, hidden], w3: [hidden, action_dim]
    (i.e. [in_features, out_features] - transposed vs. PyTorch's [out, in]).
    Use compute_dtype=jnp.float32 for bit-exact f32 parity with PyTorch.
    """
    s2, hidden = w1.shape
    action_dim = w3.shape[1]
    n_cols = max(hidden, action_dim)

    def pad_cols(a):
        return jnp.pad(a, ((0, 0), (0, n_cols - a.shape[-1])))

    w_packed = jnp.concatenate(
        [pad_cols(w1), pad_cols(w2), pad_cols(w3)], axis=0
    ).astype(compute_dtype)                               # [2S + 2H, n_cols]
    b_packed = jnp.concatenate(
        [pad_cols(b1.reshape(1, -1)),
         pad_cols(b2.reshape(1, -1)),
         pad_cols(b3.reshape(1, -1))], axis=0
    ).astype(jnp.float32)                                 # [3, n_cols]
    return w_packed, b_packed, (s2, hidden, action_dim)


# ---------------------------------------------------------------------------
# Wrapper
# ---------------------------------------------------------------------------
def idm_forward(state, next_state, packed_params, *, max_rows_per_tile=2048):
    """Fused MLP forward. state/next_state: [B, state_dim]."""
    w_packed, b_packed, (s2, hidden, action_dim) = packed_params
    B = state.shape[0]

    # Concatenate once in the wrapper; carry inputs in the compute dtype (bf16 by
    # default) since the kernel is HBM-read-bound.
    x = jnp.concatenate([state, next_state], axis=-1).astype(w_packed.dtype)

    # Row tile: as large as VMEM comfortably allows (a [TM, 32] bf16 block pads to
    # 128 lanes -> TM*128*2 B per buffer; 2048 rows ~= 0.5 MiB, well within the
    # 32 MiB scoped default even double-buffered on v7x). Pad B to a multiple of TM.
    tm = min(max_rows_per_tile, _round_up(B, 8))
    b_pad = _round_up(B, tm)
    if b_pad != B:
        x = jnp.pad(x, ((0, b_pad - B), (0, 0)))

    kernel = functools.partial(
        idm_kernel, s2=s2, hidden=hidden, action_dim=action_dim)

    # TODO(synk): output last dim (action_dim) < 128 lowers to masked partial stores;
    # only worth padding to a lane-dense slab if profiling shows the store path binds.
    out = pl.pallas_call(
        kernel,
        out_shape=jax.ShapeDtypeStruct((b_pad, action_dim), jnp.float32),
        grid=(b_pad // tm,),
        in_specs=[
            pl.BlockSpec((tm, s2), lambda i: (i, 0)),            # row tile of inputs
            pl.BlockSpec(w_packed.shape, lambda i: (0, 0)),      # weights, resident
            pl.BlockSpec(b_packed.shape, lambda i: (0, 0)),      # biases, resident
        ],
        out_specs=pl.BlockSpec((tm, action_dim), lambda i: (i, 0)),
        compiler_params=pltpu.CompilerParams(
            dimension_semantics=("parallel",)),                  # megacore on v7x
    )(x, w_packed, b_packed)

    return out[:B]


# ---------------------------------------------------------------------------
# Plain-JAX reference (same dtype path as the kernel)
# ---------------------------------------------------------------------------
def idm_reference(state, next_state, packed_params):
    w_packed, b_packed, (s2, hidden, action_dim) = packed_params
    w1 = w_packed[0:s2, 0:hidden]
    w2 = w_packed[s2:s2 + hidden, 0:hidden]
    w3 = w_packed[s2 + hidden:s2 + 2 * hidden, 0:action_dim]
    b1 = b_packed[0, 0:hidden]
    b2 = b_packed[1, 0:hidden]
    b3 = b_packed[2, 0:action_dim]

    x = jnp.concatenate([state, next_state], axis=-1).astype(w_packed.dtype)
    h = jnp.dot(x, w1, preferred_element_type=jnp.float32) + b1
    h = _leaky_relu(h)
    h = jnp.dot(h.astype(w2.dtype), w2, preferred_element_type=jnp.float32) + b2
    h = _leaky_relu(h)
    return jnp.dot(h.astype(w3.dtype), w3, preferred_element_type=jnp.float32) + b3


def init_params(key, state_dim, action_dim, hidden=8):
    """Deterministic synthetic parameters (stored [in, out], i.e. PyTorch W^T)."""
    ks = jax.random.split(key, 6)
    scale = 0.1
    w1 = scale * jax.random.normal(ks[0], (2 * state_dim, hidden), jnp.float32)
    b1 = scale * jax.random.normal(ks[1], (hidden,), jnp.float32)
    w2 = scale * jax.random.normal(ks[2], (hidden, hidden), jnp.float32)
    b2 = scale * jax.random.normal(ks[3], (hidden,), jnp.float32)
    w3 = scale * jax.random.normal(ks[4], (hidden, action_dim), jnp.float32)
    b3 = scale * jax.random.normal(ks[5], (action_dim,), jnp.float32)
    return w1, b1, w2, b2, w3, b3


if __name__ == "__main__":
    batch = 8
    state_dim = 16
    action_dim = 4

    key = jax.random.PRNGKey(0)
    k_state, k_next, k_params = jax.random.split(key, 3)

    state = jax.random.normal(k_state, (batch, state_dim), jnp.float32)
    next_state = jax.random.normal(k_next, (batch, state_dim), jnp.float32)

    raw = init_params(k_params, state_dim, action_dim)
    packed = pack_params(*raw)  # bf16 weights, f32 biases

    out = idm_forward(state, next_state, packed)
    out = jax.block_until_ready(out)

    ref = idm_reference(state, next_state, packed)
    assert out.shape == (batch, action_dim)
    assert jnp.allclose(out, ref, atol=1e-2, rtol=1e-2), "mismatch vs reference"

    print("KERNEL_OK")
</pallas_src>

<mosaic_0001>
module attributes {stable_mosaic.version = 11 : i64} {
  func.func @idm_kernel(%arg0: i32, %arg1: memref<8x32xbf16, #tpu.memory_space<vmem>>, %arg2: memref<48x8xbf16, #tpu.memory_space<vmem>>, %arg3: memref<3x8xf32, #tpu.memory_space<vmem>>, %arg4: memref<8x4xf32, #tpu.memory_space<vmem>>) attributes {dimension_semantics = [#tpu.dimension_semantics<parallel>], iteration_bounds = array<i64: 1>, scalar_prefetch = 0 : i64, scratch_operands = 0 : i64, tpu.core_type = #tpu.core_type<tc>, window_params = [{transform_indices = @transform_0, window_bounds = array<i64: 8, 32>}, {pipeline_mode = #tpu.pipeline_mode<synchronous>, transform_indices = @transform_1, window_bounds = array<i64: 48, 8>}, {pipeline_mode = #tpu.pipeline_mode<synchronous>, transform_indices = @transform_2, window_bounds = array<i64: 3, 8>}, {transform_indices = @transform_3, window_bounds = array<i64: 8, 4>}]} {
    %c0 = arith.constant 0 : index
    %c0_0 = arith.constant 0 : index
    %0 = vector.load %arg1[%c0, %c0_0] : memref<8x32xbf16, #tpu.memory_space<vmem>>, vector<8x32xbf16>
    %c0_1 = arith.constant 0 : index
    %c0_2 = arith.constant 0 : index
    %1 = vector.load %arg2[%c0_1, %c0_2] : memref<48x8xbf16, #tpu.memory_space<vmem>>, vector<32x8xbf16>
    %c32 = arith.constant 32 : index
    %c0_3 = arith.constant 0 : index
    %2 = vector.load %arg2[%c32, %c0_3] : memref<48x8xbf16, #tpu.memory_space<vmem>>, vector<8x8xbf16>
    %c40 = arith.constant 40 : index
    %c0_4 = arith.constant 0 : index
    %3 = vector.load %arg2[%c40, %c0_4] : memref<48x8xbf16, #tpu.memory_space<vmem>>, vector<8x4xbf16>
    %c0_5 = arith.constant 0 : index
    %c0_6 = arith.constant 0 : index
    %4 = vector.load %arg3[%c0_5, %c0_6] : memref<3x8xf32, #tpu.memory_space<vmem>>, vector<1x8xf32>
    %c1 = arith.constant 1 : index
    %c0_7 = arith.constant 0 : index
    %5 = vector.load %arg3[%c1, %c0_7] : memref<3x8xf32, #tpu.memory_space<vmem>>, vector<1x8xf32>
    %c2 = arith.constant 2 : index
    %c0_8 = arith.constant 0 : index
    %6 = vector.load %arg3[%c2, %c0_8] : memref<3x8xf32, #tpu.memory_space<vmem>>, vector<1x4xf32>
    %cst = arith.constant dense<0.000000e+00> : vector<8x8xf32>
    %7 = tpu.matmul %0, %1, %cst {dimension_numbers = #tpu.dot_dimension_numbers<[1], [0], [0], [1], [0, 0, 1, 1], [], []>} : vector<8x32xbf16>, vector<32x8xbf16>, vector<8x8xf32> -> vector<8x8xf32>
    %8 = vector.broadcast %4 : vector<1x8xf32> to vector<8x8xf32>
    %9 = arith.addf %7, %8 : vector<8x8xf32>
    %cst_9 = arith.constant 0.000000e+00 : f32
    %10 = vector.broadcast %cst_9 : f32 to vector<8x8xf32>
    %11 = arith.cmpf ogt, %9, %10 : vector<8x8xf32>
    %cst_10 = arith.constant 2.000000e-01 : f32
    %12 = vector.broadcast %cst_10 : f32 to vector<8x8xf32>
    %13 = arith.mulf %12, %9 : vector<8x8xf32>
    %14 = arith.select %11, %9, %13 : vector<8x8xi1>, vector<8x8xf32>
    %15 = arith.truncf %14 : vector<8x8xf32> to vector<8x8xbf16>
    %cst_11 = arith.constant dense<0.000000e+00> : vector<8x8xf32>
    %16 = tpu.matmul %15, %2, %cst_11 {dimension_numbers = #tpu.dot_dimension_numbers<[1], [0], [0], [1], [0, 0, 1, 1], [], []>} : vector<8x8xbf16>, vector<8x8xbf16>, vector<8x8xf32> -> vector<8x8xf32>
    %17 = vector.broadcast %5 : vector<1x8xf32> to vector<8x8xf32>
    %18 = arith.addf %16, %17 : vector<8x8xf32>
    %cst_12 = arith.constant 0.000000e+00 : f32
    %19 = vector.broadcast %cst_12 : f32 to vector<8x8xf32>
    %20 = arith.cmpf ogt, %18, %19 : vector<8x8xf32>
    %cst_13 = arith.constant 2.000000e-01 : f32
    %21 = vector.broadcast %cst_13 : f32 to vector<8x8xf32>
    %22 = arith.mulf %21, %18 : vector<8x8xf32>
    %23 = arith.select %20, %18, %22 : vector<8x8xi1>, vector<8x8xf32>
    %24 = arith.truncf %23 : vector<8x8xf32> to vector<8x8xbf16>
    %cst_14 = arith.constant dense<0.000000e+00> : vector<8x4xf32>
    %25 = tpu.matmul %24, %3, %cst_14 {dimension_numbers = #tpu.dot_dimension_numbers<[1], [0], [0], [1], [0, 0, 1, 1], [], []>} : vector<8x8xbf16>, vector<8x4xbf16>, vector<8x4xf32> -> vector<8x4xf32>
    %26 = vector.broadcast %6 : vector<1x4xf32> to vector<8x4xf32>
    %27 = arith.addf %25, %26 : vector<8x4xf32>
    %c0_15 = arith.constant 0 : index
    %c0_16 = arith.constant 0 : index
    %28 = vector.load %arg4[%c0_15, %c0_16] : memref<8x4xf32, #tpu.memory_space<vmem>>, vector<8x4xf32>
    tpu.vector_store %arg4[%c0_15, %c0_16], %27 {strides = array<i32>} : memref<8x4xf32, #tpu.memory_space<vmem>>, vector<8x4xf32>,
    return
  }
  func.func @transform_0(%arg0: i32) -> (i32, i32) {
    %c0_i32 = arith.constant 0 : i32
    %c0_i32_0 = arith.constant 0 : i32
    return %arg0, %c0_i32 : i32, i32
  }
  func.func @transform_1(%arg0: i32) -> (i32, i32) {
    %c0_i32 = arith.constant 0 : i32
    %c0_i32_0 = arith.constant 0 : i32
    %c0_i32_1 = arith.constant 0 : i32
    return %c0_i32, %c0_i32_0 : i32, i32
  }
  func.func @transform_2(%arg0: i32) -> (i32, i32) {
    %c0_i32 = arith.constant 0 : i32
    %c0_i32_0 = arith.constant 0 : i32
    %c0_i32_1 = arith.constant 0 : i32
    return %c0_i32, %c0_i32_0 : i32, i32
  }
  func.func @transform_3(%arg0: i32) -> (i32, i32) {
    %c0_i32 = arith.constant 0 : i32
    %c0_i32_0 = arith.constant 0 : i32
    return %arg0, %c0_i32 : i32, i32
  }
}

</mosaic_0001>

<bundles_post_ra>
// kernel: tpu_custom_call.1
= control target key start
LH: loop header
LB: loop body
LE: loop exit
PB: predicated region body
PF: predicated region fallthrough
CT: control target
= control target key end

     0   :  { %v240_v0 = vmov 0.0   ;;  %vm241_vm0 = vmmov 0   ;;  %vm41_vm1 = vcmask 261120   ;;  %vm97_vm2 = vcmask 1043456   ;;  %s296_s1 = inlined_call_operand.vmem [shape: bf16[48,8], index: 1, kind: input, shape index: {}]   ;;  %s297_s0 = inlined_call_operand.vmem [shape: bf16[8,32], index: 0, kind: input, shape index: {}]   ;;  %s298_s2 = inlined_call_operand.vmem [shape: f32[3,8], index: 2, kind: input, shape index: {}]   ;;  %s299_s3 = inlined_call_operand.vmem [shape: f32[8,4], index: 3, kind: output, shape index: {}]  }
   0x1   :  { %216 = vmatprep.subr.bf16.mxu0 %v240_v0  ;;  %v238_v1 = vld [vmem:[%s296_s1] sm:$0xff]   ;;  %220 = vmatprep.mubr.msk.bf16.mxu0 %vm241_vm0, %v240_v0  ;;  %v239_v2 = vld [vmem:[%s296_s1 + $0x8] sm:$0xff]   ;;  %v20_v4 = vld [vmem:[%s296_s1 + $0x10] sm:$0xf]  ;;  %vm93_vm4 = vcmask 64512   ;;  %vm195_vm6 = vcmask 31744  }
   0x2   :  { %224 = vmatprep.subr.bf16.mxu1 %v240_v0  ;;  %226 = vmatprep.mubr.msk.bf16.mxu1 %vm241_vm0, %v240_v0  ;;  %v15_v3 = vld [vmem:[%s297_s0] sm:$0xf]  ;;  %v99_v5 = vsel %vm97_vm2, %v20_v4, 0  ;;  %v21_v13 = vld [vmem:[%s296_s1 + $0x14] sm:$0xf] }
   0x3   :  { %217 = vmatpush3.bf16.msra.mxu0 %v238_v1  ;;  %225 = vmatpush3.bf16.msra.mxu1 %v99_v5  ;;  %v201_v6 = vld [vmem:[%s298_s2] ss:$0 sm:$0xff]  ;;  %v153_v16 = vsel %vm97_vm2, %v21_v13, 0  ;;  %v205_v17 = vld [vmem:[%s298_s2 + $0x1] ss:$0 sm:$0xff] }
   0x4   :  { %218 = vmatprep.subr.bf16.mxu0 %v240_v0  ;;  %230 = vmatprep.subr.bf16.mxu1 %v240_v0  ;;  %v207_v26 = vld [vmem:[%s298_s2 + $0x2] ss:$0 sm:$0xff] }
   0x7   :  { %219 = vmatpush3.bf16.msra.mxu0 %v239_v2 }
   0xa   :  { %221 = vmatmul.mubr.msk.bf16.vlgmr.msra.gmra.mrb[0].mxu0 %vm41_vm1, %v15_v3 }
  0xdd   :  { %v79_v7 = vpop.f32.mrb[0].mxu0 }
  0xde   :  { %v80_v8 = vadd.f32 %v201_v6, %v79_v7  ;;  %v222_v9 = vpop.f32.mrb[1].mxu0 }
  0xdf   :  { %v82_v10 = vpop.f32.mrb[2].mxu0 }
  0xe0   :  { %vm85_vm3 = vcmp.gt.f32.partialorder %v80_v8, 0.0  ;;  %v86_v11 = vmul.f32 0.2, %v80_v8  ;;  %v223_v12 = vpop.f32.mrb[3].mxu0 }
  0xe2   :  { %v87_v14 = vsel %vm85_vm3, %v80_v8, %v86_v11 }
  0xe3   :  { %v88_v15 = vpack.c.bf16 %v87_v14, %v87_v14 }
  0xe5   :  { %227 = vmatmul.mubr.msk.bf16.vlgmr.msra.gmra.mrb[0].mxu1 %vm93_vm4, %v88_v15 }
  0xe6   :  { %231 = vmatpush3.bf16.msra.mxu1 %v153_v16  ;;  %232 = vmatprep.mubr.msk.bf16.mxu1 %vm241_vm0, %v240_v0 }
 0x1b8   :  { %v135_v18 = vpop.f32.mrb[0].mxu1 }
 0x1b9   :  { %v136_v19 = vadd.f32 %v205_v17, %v135_v18  ;;  %v228_v20 = vpop.f32.mrb[1].mxu1 }
 0x1ba   :  { %v138_v21 = vpop.f32.mrb[2].mxu1 }
 0x1bb   :  { %vm141_vm5 = vcmp.gt.f32.partialorder %v136_v19, 0.0  ;;  %v142_v22 = vmul.f32 0.2, %v136_v19  ;;  %v229_v23 = vpop.f32.mrb[3].mxu1 }
 0x1bd   :  { %v143_v24 = vsel %vm141_vm5, %v136_v19, %v142_v22 }
 0x1be   :  { %v144_v25 = vpack.c.bf16 %v143_v24, %v143_v24 }
 0x1c0   :  { %233 = vmatmul.mubr.msk.bf16.vlgmr.msra.gmra.mrb[4].mxu1 %vm93_vm4, %v144_v25 }
 0x293   :  { %v189_v27 = vpop.f32.mrb[4].mxu1 }
 0x294   :  { %v190_v28 = vadd.f32 %v207_v26, %v189_v27  ;;  %v234_v29 = vpop.f32.mrb[5].mxu1 }
 0x295   :  { %v192_v30 = vpop.f32.mrb[6].mxu1 }
 0x296   :  { %196 = vst.msk [vmem:[%s299_s3] sm:$0xff] %vm195_vm6, %v190_v28  ;;  %v235_v31 = vpop.f32.mrb[7].mxu1 }

</bundles_post_ra>
